<compile_context>
chip_gen: v7x
topology: tpu7x:2x2x1
jax: 0.10.0
libtpu: 0.0.40
codegen_flags: <defaults>
</compile_context>

<pallas_src>
import functools
from math import gcd

import jax
import jax.numpy as jnp
from jax.experimental import pallas as pl
from jax.experimental.pallas import tpu as pltpu


def _attention_pool_lane_dense_kernel(kv_ref, bdw_ref, gsum_ref, o_ref, *, n, d):
    # kv_ref: (tb, F) lane-dense in its native dtype; bdw_ref: (F, F) bf16 block-diag W.T;
    # gsum_ref: (F, d) bf16 group-sum matrix; o_ref: (tb, d).  F = n*d.
    kv = kv_ref[...]                                   # native dtype, no extra DMA cost
    kv_bf = kv.astype(jnp.bfloat16)                    # bf16 MXU operand
    bdw = bdw_ref[...]                                 # bf16
    gsum = gsum_ref[...]                               # bf16

    # Per-window-slot Linear(dim_head, dim_head, bias=False): one bf16 MXU matmul, f32 accum.
    logits = jnp.dot(kv_bf, bdw, preferred_element_type=jnp.float32)       # (tb, F) f32

    # Max over the n window slots, broadcast back across the n groups of d lanes,
    # via a circular lane-roll tree (max is idempotent -> exact for any n).
    m = logits
    shift = d
    for _ in range(max(n - 1, 0).bit_length()):
        m = jnp.maximum(m, pltpu.roll(m, shift, axis=1))
        shift *= 2

    p = jnp.exp(logits - m)                                                # (tb, F) f32 (EUP)

    # Window-axis reductions on the (otherwise idle) MXU, f32 accumulation.
    denom = jnp.dot(p.astype(jnp.bfloat16), gsum,
                    preferred_element_type=jnp.float32)                    # (tb, d)
    wkv = (kv.astype(jnp.float32) * p).astype(jnp.bfloat16)                # f32 VPU mul (v5e-safe)
    pooled = jnp.dot(wkv, gsum, preferred_element_type=jnp.float32)        # (tb, d)

    o_ref[...] = (pooled * pl.reciprocal(denom, approx=True)).astype(o_ref.dtype)


def _round_up(x, m):
    return ((x + m - 1) // m) * m


def _round_down(x, m):
    return max((x // m) * m, m)


def _vmem_capacity_bytes():
    # Trace-time hardware query; conservative fallback (v7x per-TC capacity) if unavailable.
    try:
        info = pltpu.get_tpu_info()
        cap = getattr(info, "vmem_capacity_bytes", None)
        if cap:
            return int(cap)
    except Exception:
        pass
    return 64 * 1024 * 1024


@functools.partial(jax.jit, static_argnames=("block_rows",))
def attention_pool(kv, weight, *, block_rows=None):
    """AttentionPool forward.  kv: (b, h, w, n, d); weight: (d, d) Linear weight ([out, in])."""
    b, h, w, n, d = kv.shape
    B = b * h * w

    # Pad d -> d_pad so that F = n * d_pad is a multiple of 128: every shape is lane-dense.
    # Padded channels carry zeros through logits/softmax/pool and are sliced off at the end.
    unit = 128 // gcd(n, 128)
    d_pad = _round_up(d, unit)
    F = n * d_pad

    if d_pad != d:
        kv = jnp.pad(kv, ((0, 0), (0, 0), (0, 0), (0, 0), (0, d_pad - d)))
    kv_flat = kv.reshape(B, F)                                  # contiguous, free reshape

    # Constant MXU operands in bf16 (built once in the wrapper).
    wt = weight.T.astype(jnp.float32)                           # (in, out)
    if d_pad != d:
        wt = jnp.pad(wt, ((0, d_pad - d), (0, d_pad - d)))
    bdw = jnp.kron(jnp.eye(n, dtype=jnp.float32), wt).astype(jnp.bfloat16)      # (F, F)
    gsum = jnp.kron(jnp.ones((n, 1), jnp.float32),
                    jnp.eye(d_pad, dtype=jnp.float32)).astype(jnp.bfloat16)     # (F, d_pad)

    # ---- Generation/shape-aware VMEM budget and row-tile sizing -------------------------
    vmem_cap = _vmem_capacity_bytes()
    scoped_vmem = min(vmem_cap // 2, 96 * 1024 * 1024)          # 32 MiB on v7x, 64 MiB on v5e/v6e
    if block_rows is None:
        block_rows = 4096 if (scoped_vmem >= 64 * 1024 * 1024 and F <= 256) else 2048

    in_item = jnp.dtype(kv.dtype).itemsize
    # Budget: double-buffered input tile + ~4 f32 (tb, F) temporaries + output, plus constants.
    const_bytes = 2 * (F * F * 2 + F * d_pad * 2)               # worst case: double-buffered bf16
    per_row = 2 * F * in_item + 4 * F * 4 + 2 * d_pad * in_item
    tb_cap = max((scoped_vmem - const_bytes - (2 << 20)) // per_row, 8)
    tb_cap = _round_down(int(tb_cap), 8)
    tb = min(block_rows, tb_cap)

    if B <= tb:
        if B >= 16:
            # Guarantee >=2 grid steps so the "parallel" axis shards across both v7x TensorCores.
            tb = _round_up(-(-B // 2), 8)
        else:
            tb = B                                              # tiny: single full-extent tile
    grid = (pl.cdiv(B, tb),)

    compiler_params = pltpu.CompilerParams(
        dimension_semantics=("parallel",),
        vmem_limit_bytes=int(scoped_vmem),
    )

    # Constant operands are grid-resident (constant index_map); single-buffer them when large.
    if F >= 512:
        bdw_spec = pl.BlockSpec((F, F), lambda i: (0, 0), pipeline_mode=pl.Buffered(1))
        gsum_spec = pl.BlockSpec((F, d_pad), lambda i: (0, 0), pipeline_mode=pl.Buffered(1))
    else:
        bdw_spec = pl.BlockSpec((F, F), lambda i: (0, 0))
        gsum_spec = pl.BlockSpec((F, d_pad), lambda i: (0, 0))

    out_flat = pl.pallas_call(
        functools.partial(_attention_pool_lane_dense_kernel, n=n, d=d_pad),
        out_shape=jax.ShapeDtypeStruct((B, d_pad), kv.dtype),
        grid_spec=pltpu.PrefetchScalarGridSpec(
            num_scalar_prefetch=0,
            grid=grid,
            in_specs=[
                pl.BlockSpec((tb, F), lambda i: (i, 0)),
                bdw_spec,
                gsum_spec,
            ],
            out_specs=pl.BlockSpec((tb, d_pad), lambda i: (i, 0)),
        ),
        compiler_params=compiler_params,
    )(kv_flat, bdw, gsum)

    if d_pad != d:
        out_flat = out_flat[:, :d]
    return out_flat.reshape(b, h, w, d)


def attention_pool_ref(kv, weight):
    # Pure-JAX reference mirroring the PyTorch module (f32 throughout).
    logits = jnp.einsum("bhwnd,ed->bhwne", kv, weight)
    attn = jax.nn.softmax(logits, axis=-2)
    return jnp.einsum("bhwnd,bhwnd->bhwd", kv, attn)


if __name__ == "__main__":
    # kv is (batch, heads, num_windows, compress_window_size, dim_head)
    b, h, w = 2, 2, 4
    compress_window_size = 8     # n
    dim_head = 32                # d

    key = jax.random.PRNGKey(0)
    kv = jax.random.normal(
        key, (b, h, w, compress_window_size, dim_head), dtype=jnp.float32
    )

    # Parameter init per the module's __init__: Linear weight copied from identity.
    weight = jnp.eye(dim_head, dtype=jnp.float32)

    out = attention_pool(kv, weight)
    out = jax.block_until_ready(out)

    ref = attention_pool_ref(kv, weight)
    assert out.shape == (b, h, w, dim_head)
    assert jnp.all(jnp.isfinite(out))
    # bf16 MXU operands (kv/W/p quantized to bf16, f32 accumulation) plus the approx-reciprocal
    # introduce ~1e-2-level relative error vs the exact f32 reference.
    assert jnp.allclose(out, ref, atol=5e-2, rtol=5e-2), float(jnp.max(jnp.abs(out - ref)))

    print("KERNEL_OK")
</pallas_src>

<mosaic_0001>
module attributes {stable_mosaic.version = 11 : i64} {
  func.func @_attention_pool_lane_dense_kernel(%arg0: i32, %arg1: memref<8x256xf32, #tpu.memory_space<vmem>>, %arg2: memref<256x256xbf16, #tpu.memory_space<vmem>>, %arg3: memref<256x32xbf16, #tpu.memory_space<vmem>>, %arg4: memref<8x32xf32, #tpu.memory_space<vmem>>) attributes {dimension_semantics = [#tpu.dimension_semantics<parallel>], iteration_bounds = array<i64: 2>, scalar_prefetch = 0 : i64, scratch_operands = 0 : i64, tpu.core_type = #tpu.core_type<tc>, window_params = [{transform_indices = @transform_0, window_bounds = array<i64: 8, 256>}, {pipeline_mode = #tpu.pipeline_mode<synchronous>, transform_indices = @transform_1, window_bounds = array<i64: 256, 256>}, {pipeline_mode = #tpu.pipeline_mode<synchronous>, transform_indices = @transform_2, window_bounds = array<i64: 256, 32>}, {transform_indices = @transform_3, window_bounds = array<i64: 8, 32>}]} {
    %c0 = arith.constant 0 : index
    %c0_0 = arith.constant 0 : index
    %0 = vector.load %arg1[%c0, %c0_0] : memref<8x256xf32, #tpu.memory_space<vmem>>, vector<8x256xf32>
    %1 = arith.truncf %0 : vector<8x256xf32> to vector<8x256xbf16>
    %c0_1 = arith.constant 0 : index
    %c0_2 = arith.constant 0 : index
    %2 = vector.load %arg2[%c0_1, %c0_2] : memref<256x256xbf16, #tpu.memory_space<vmem>>, vector<256x256xbf16>
    %c0_3 = arith.constant 0 : index
    %c0_4 = arith.constant 0 : index
    %3 = vector.load %arg3[%c0_3, %c0_4] : memref<256x32xbf16, #tpu.memory_space<vmem>>, vector<256x32xbf16>
    %cst = arith.constant dense<0.000000e+00> : vector<8x256xf32>
    %4 = tpu.matmul %1, %2, %cst {dimension_numbers = #tpu.dot_dimension_numbers<[1], [0], [0], [1], [0, 0, 1, 1], [], []>} : vector<8x256xbf16>, vector<256x256xbf16>, vector<8x256xf32> -> vector<8x256xf32>
    %c32_i32 = arith.constant 32 : i32
    %5 = tpu.dynamic_rotate %4 by %c32_i32 dim 1 : vector<8x256xf32>, i32 -> vector<8x256xf32>
    %6 = arith.maximumf %4, %5 : vector<8x256xf32>
    %c64_i32 = arith.constant 64 : i32
    %7 = tpu.dynamic_rotate %6 by %c64_i32 dim 1 : vector<8x256xf32>, i32 -> vector<8x256xf32>
    %8 = arith.maximumf %6, %7 : vector<8x256xf32>
    %c128_i32 = arith.constant 128 : i32
    %9 = tpu.dynamic_rotate %8 by %c128_i32 dim 1 : vector<8x256xf32>, i32 -> vector<8x256xf32>
    %10 = arith.maximumf %8, %9 : vector<8x256xf32>
    %11 = arith.subf %4, %10 : vector<8x256xf32>
    %12 = math.exp %11 : vector<8x256xf32>
    %13 = arith.truncf %12 : vector<8x256xf32> to vector<8x256xbf16>
    %cst_5 = arith.constant dense<0.000000e+00> : vector<8x32xf32>
    %14 = tpu.matmul %13, %3, %cst_5 {dimension_numbers = #tpu.dot_dimension_numbers<[1], [0], [0], [1], [0, 0, 1, 1], [], []>} : vector<8x256xbf16>, vector<256x32xbf16>, vector<8x32xf32> -> vector<8x32xf32>
    %15 = arith.mulf %0, %12 : vector<8x256xf32>
    %16 = arith.truncf %15 : vector<8x256xf32> to vector<8x256xbf16>
    %cst_6 = arith.constant dense<0.000000e+00> : vector<8x32xf32>
    %17 = tpu.matmul %16, %3, %cst_6 {dimension_numbers = #tpu.dot_dimension_numbers<[1], [0], [0], [1], [0, 0, 1, 1], [], []>} : vector<8x256xbf16>, vector<256x32xbf16>, vector<8x32xf32> -> vector<8x32xf32>
    %18 = tpu.reciprocal %14 {approx = true} : vector<8x32xf32> -> vector<8x32xf32>
    %19 = arith.mulf %17, %18 : vector<8x32xf32>
    %c0_7 = arith.constant 0 : index
    %c0_8 = arith.constant 0 : index
    %20 = vector.load %arg4[%c0_7, %c0_8] : memref<8x32xf32, #tpu.memory_space<vmem>>, vector<8x32xf32>
    tpu.vector_store %arg4[%c0_7, %c0_8], %19 {strides = array<i32>} : memref<8x32xf32, #tpu.memory_space<vmem>>, vector<8x32xf32>,
    return
  }
  func.func @transform_0(%arg0: i32) -> (i32, i32) {
    %c0_i32 = arith.constant 0 : i32
    %c0_i32_0 = arith.constant 0 : i32
    return %arg0, %c0_i32 : i32, i32
  }
  func.func @transform_1(%arg0: i32) -> (i32, i32) {
    %c0_i32 = arith.constant 0 : i32
    %c0_i32_0 = arith.constant 0 : i32
    %c0_i32_1 = arith.constant 0 : i32
    return %c0_i32, %c0_i32_0 : i32, i32
  }
  func.func @transform_2(%arg0: i32) -> (i32, i32) {
    %c0_i32 = arith.constant 0 : i32
    %c0_i32_0 = arith.constant 0 : i32
    %c0_i32_1 = arith.constant 0 : i32
    return %c0_i32, %c0_i32_0 : i32, i32
  }
  func.func @transform_3(%arg0: i32) -> (i32, i32) {
    %c0_i32 = arith.constant 0 : i32
    %c0_i32_0 = arith.constant 0 : i32
    return %arg0, %c0_i32 : i32, i32
  }
}

</mosaic_0001>

<bundles_post_ra>
// kernel: attention_pool.1
= control target key start
LH: loop header
LB: loop body
LE: loop exit
PB: predicated region body
PF: predicated region fallthrough
CT: control target
= control target key end

     0   :  { %8 = vsyncpa [#allocation3], 0  ;;  %s1297_s0 = inlined_call_operand.vmem [shape: f32[16,256], index: 0, kind: input, shape index: {}]   ;;  %s1298_s1 = inlined_call_operand.vmem [shape: bf16[256,256], index: 1, kind: input, shape index: {}]   ;;  %s1299_s2 = inlined_call_operand.vmem [shape: bf16[256,32], index: 2, kind: input, shape index: {}]   ;;  %s1300_s3 = inlined_call_operand.hbm [shape: f32[16,32], index: 3, kind: output, shape index: {}]  }
   0x1   :  { %10 = vsyncpa [#allocation3 + $0x1], 0  ;;  %s1027_s12 = smov 0   ;;  %s1029_s13 = smov 0  }
   0x2   :  { %s1031_s14 = smov 0   ;;  %s1033_s15 = smov 0  }
   0x3 LB: > { %s1048_s16 = sadd.s32 4294967295, %s1002_s15   ;;  %s725_s17 = sadd.s32 4294967294, %s1002_s15   ;;  %s1002_s15 = sphi %s1033_s15, %s1306_s15   ;;  %s998_s14 = sphi %s1031_s14, %s1305_s14   ;;  %s994_s13 = sphi %s1029_s13, %s1304_s13   ;;  %s990_s12 = sphi %s1027_s12, %s1303_s12  }
   0x4   : > { %s1052_s18 = sadd.s32 1, %s1002_s15   ;;  %s91_s19 = sadd.s32 1, %s998_s14 }
   0x5   : > { %s88_s20 = ssub.s32 %s1002_s15, %s1052_s18  ;;  %p101_p0 = scmp.ne.s32.totalorder %s998_s14, %s994_s13 }
   0x6   : > { %p89_p1 = scmp.eq.s32.totalorder %s88_s20, 0  ;;  %p102_p2 = scmp.eq.s32.totalorder %s1048_s16, 1 }
   0x7   : > { %p107_p3 = scmp.ne.s32.totalorder %s994_s13, %s990_s12  ;;  %p108_p4 = scmp.eq.s32.totalorder %s725_s17, 1 }
   0x8   : > { %s1063_s21 = scalar_select %p89_p1, %s998_s14, %s91_s19  }
   0x9   : > { %p1065_p5 = por %p102_p2, %p101_p0  ;;  %p1069_p6 = por %p108_p4, %p107_p3 }
   0xa   : > { %p728_p7 = scmp.ge.s32.totalorder %s1002_s15, 1  ;;  %p140_p8 = scmp.lt.s32.totalorder %s1002_s15, 3 }
   0xc   : > { %p141_p9 = pnand %p728_p7, %p140_p8 }
   0xd   : > { %v870_v0 = vld [vmem:[%s1298_s1 + $0x4] ss:$8 sps:$4 sm:$0xff] (!%p141_p9)   ;;  %v872_v1 = vld [vmem:[%s1298_s1] ss:$8 sps:$4 sm:$0xff] (!%p141_p9)   ;;  %v873_v2 = vld [vmem:[%s1298_s1 + $0x14] ss:$8 sps:$4 sm:$0xff] (!%p141_p9)   ;;  %v443_v44 = vlaneseq (!%p141_p9) }
   0xe   : > { %144 = sbr.rel (%p141_p9) target bundleno = 818 (0x332), region = 32  ;;  %398 = vmatprep.subr.bf16.mxu0 (!%p141_p9), %v870_v0  ;;  %v875_v3 = vld [vmem:[%s1298_s1 + $0x10] ss:$8 sps:$4 sm:$0xff] (!%p141_p9)   ;;  %v876_v4 = vld [vmem:[%s1298_s1 + $0x24] ss:$8 sps:$4 sm:$0xff] (!%p141_p9)   ;;  %p164_p10 = scmp.lt.s32.totalorder (!%p141_p9), %s1048_s16, 1 }
   0xf   : > { %399 = vmatpush1.bf16.msra.mxu0 (!%p141_p9), %v872_v1  ;;  %v878_v5 = vld [vmem:[%s1298_s1 + $0x20] ss:$8 sps:$4 sm:$0xff] (!%p141_p9)   ;;  %v879_v6 = vld [vmem:[%s1298_s1 + $0x34] ss:$8 sps:$4 sm:$0xff] (!%p141_p9)   ;;  %v881_v7 = vld [vmem:[%s1298_s1 + $0x30] ss:$8 sps:$4 sm:$0xff] (!%p141_p9)  }
  0x10   : > { %400 = vmatprep.subr.bf16.mxu0 (!%p141_p9), %v873_v2  ;;  %v882_v8 = vld [vmem:[%s1298_s1 + $0x44] ss:$8 sps:$4 sm:$0xff] (!%p141_p9)   ;;  %v884_v9 = vld [vmem:[%s1298_s1 + $0x40] ss:$8 sps:$4 sm:$0xff] (!%p141_p9)   ;;  %v885_v10 = vld [vmem:[%s1298_s1 + $0x54] ss:$8 sps:$4 sm:$0xff] (!%p141_p9)  }
  0x11   : > { %v887_v11 = vld [vmem:[%s1298_s1 + $0x50] ss:$8 sps:$4 sm:$0xff] (!%p141_p9)   ;;  %v888_v12 = vld [vmem:[%s1298_s1 + $0x64] ss:$8 sps:$4 sm:$0xff] (!%p141_p9)   ;;  %v890_v13 = vld [vmem:[%s1298_s1 + $0x60] ss:$8 sps:$4 sm:$0xff] (!%p141_p9)  }
  0x12   : > { %v891_v15 = vld [vmem:[%s1298_s1 + $0x74] ss:$8 sps:$4 sm:$0xff] (!%p141_p9)   ;;  %v893_v17 = vld [vmem:[%s1298_s1 + $0x70] ss:$8 sps:$4 sm:$0xff] (!%p141_p9)   ;;  %v894_v18 = vld [vmem:[%s1298_s1 + $0x84] ss:$8 sps:$4 sm:$0xff] (!%p141_p9)  }
  0x13   : > { %401 = vmatpush1.bf16.msra.mxu0 (!%p141_p9), %v875_v3  ;;  %v896_v19 = vld [vmem:[%s1298_s1 + $0x80] ss:$8 sps:$4 sm:$0xff] (!%p141_p9)   ;;  %v897_v20 = vld [vmem:[%s1298_s1 + $0x94] ss:$8 sps:$4 sm:$0xff] (!%p141_p9)   ;;  %v899_v21 = vld [vmem:[%s1298_s1 + $0x90] ss:$8 sps:$4 sm:$0xff] (!%p141_p9)  }
  0x14   : > { %402 = vmatprep.subr.bf16.mxu0 (!%p141_p9), %v876_v4  ;;  %v900_v22 = vld [vmem:[%s1298_s1 + $0xa4] ss:$8 sps:$4 sm:$0xff] (!%p141_p9)   ;;  %v902_v23 = vld [vmem:[%s1298_s1 + $0xa0] ss:$8 sps:$4 sm:$0xff] (!%p141_p9)   ;;  %v903_v24 = vld [vmem:[%s1298_s1 + $0xb4] ss:$8 sps:$4 sm:$0xff] (!%p141_p9)  }
  0x15   : > { %s165_s19 = scalar_select %p164_p10, %s1048_s16, 1  ;;  %v905_v25 = vld [vmem:[%s1298_s1 + $0xb0] ss:$8 sps:$4 sm:$0xff]   ;;  %v906_v26 = vld [vmem:[%s1298_s1 + $0xc4] ss:$8 sps:$4 sm:$0xff]   ;;  %v444_v47 = vand.u32 127, %v443_v44 }
  0x16   : > { %v908_v27 = vld [vmem:[%s1298_s1 + $0xc0] ss:$8 sps:$4 sm:$0xff]   ;;  %v909_v28 = vld [vmem:[%s1298_s1 + $0xd4] ss:$8 sps:$4 sm:$0xff]   ;;  %v911_v29 = vld [vmem:[%s1298_s1 + $0xd0] ss:$8 sps:$4 sm:$0xff]  }
  0x17   : > { %403 = vmatpush1.bf16.msra.mxu0 %v878_v5  ;;  %s784_s27 = sshll.u32 %s165_s19, 4  ;;  %v912_v30 = vld [vmem:[%s1298_s1 + $0xe4] ss:$8 sps:$4 sm:$0xff]   ;;  %v914_v31 = vld [vmem:[%s1298_s1 + $0xe0] ss:$8 sps:$4 sm:$0xff]   ;;  %v922_v45 = vld [vmem:[%s1299_s2 + $0x50] sm:$0xff]  }
  0x18   : > { %404 = vmatprep.subr.bf16.mxu0 %v879_v6  ;;  %s1113_s5 = scalar_lea.vmem %s1297_s0, %s784_s27  ;;  %v915_v32 = vld [vmem:[%s1298_s1 + $0xf4] ss:$8 sps:$4 sm:$0xff]   ;;  %v917_v33 = vld [vmem:[%s1298_s1 + $0xf0] ss:$8 sps:$4 sm:$0xff]   ;;  %v918_v36 = vld [vmem:[%s1299_s2 + $0x40] sm:$0xff]   ;;  %vm445_vm0 = vcmp.lt.s32.totalorder %v444_v47, 32 }
  0x19   : > { %v1125_v14 = vld [vmem:[%s1113_s5 + $0x8] sm:$0xff]  ;;  %v1184_v34 = vld [vmem:[%s1113_s5] sm:$0xff]  ;;  %s1004_s5 = smov 32   ;;  %785 = vmatprep.subr.bf16.mxu1 %v918_v36  ;;  %v923_v46 = vld [vmem:[%s1299_s2 + $0x10] sm:$0xff]   ;;  %s1005_s26 = smov 64   ;;  %vm454_vm1 = vcmp.lt.s32.totalorder %v444_v47, 64 }
  0x1a   : > { %v173_v16 = vpack.c.bf16 %v1125_v14, %v1125_v14  ;;  %v172_v35 = vpack.c.bf16 %v1184_v34, %v1184_v34  ;;  %v1194_v37 = vld [vmem:[%s1299_s2] sm:$0xff]   ;;  %v1199_v38 = vld [vmem:[%s1299_s2 + $0x48] sm:$0xff]   ;;  %v924_v49 = vld [vmem:[%s1299_s2 + $0x58] sm:$0xff]   ;;  %s161_s17 = sand.u32 1, %s994_s13   ;;  %s781_s20 = sshll.u32 %s1048_s16, 7  ;;  %vm650_vm2 = vcmask 261120  }
  0x1b   : > { %405 = vmatpush1.bf16.msra.mxu0 %v881_v7  ;;  %786 = vmatpush3.bf16.msra.mxu1 %v1194_v37  ;;  %v1205_v42 = vld [vmem:[%s1299_s2 + $0x8] sm:$0xff]   ;;  %v925_v50 = vld [vmem:[%s1299_s2 + $0x18] sm:$0xff]   ;;  %v926_v52 = vld [vmem:[%s1299_s2 + $0x60] sm:$0xff]   ;;  %s729_s19 = sshll.u32 %s161_s17, 3  ;;  %s1255_s28 = scalar_lea.hbm %s1300_s3, %s781_s20 }
  0x1c   : > { %406 = vmatprep.subr.bf16.mxu0 %v882_v8  ;;  %430 = vmatprep.mubr.bf16.mxu0 %v173_v16  ;;  %v927_v54 = vld [vmem:[%s1299_s2 + $0x20] sm:$0xff]   ;;  %v928_v57 = vld [vmem:[%s1299_s2 + $0x68] sm:$0xff]   ;;  %v930_v59 = vld [vmem:[%s1299_s2 + $0x70] sm:$0xff]   ;;  %s163_s24 = scalar_lea.vmem [#allocation2], %s729_s19  ;;  %s653_s16 = scalar_lea.sflag [#allocation3], %s161_s17 }
  0x1d   : > { %787 = vmatprep.subr.bf16.mxu1 %v1199_v38  ;;  %v929_v58 = vld [vmem:[%s1299_s2 + $0x28] sm:$0xff]   ;;  %v931_v61 = vld [vmem:[%s1299_s2 + $0x30] sm:$0xff]   ;;  %v932_v62 = vld [vmem:[%s1299_s2 + $0x78] sm:$0xff]   ;;  %s666_s25 = sshll.u32 %s163_s24, 4  ;;  %s1006_s29 = smov [#allocation2]   ;;  %s1257_s25 = int_to_ptr.vmem [resolvable:$true] %s666_s25 }
  0x1e   : > { %v933_v63 = vld [vmem:[%s1299_s2 + $0x38] sm:$0xff]   ;;  %s944_s30 = sshll.u32 %s1006_s29, 4  ;;  %s945_s30 = int_to_ptr.vmem [resolvable:$false] %s944_s30 }
  0x1f   : > { %407 = vmatpush1.bf16.msra.mxu0 %v884_v9  ;;  %788 = vmatpush3.bf16.msra.mxu1 %v1205_v42  ;;  %s946_s4 = scalar_lea.vmem %s945_s30, 256  ;;  %p947_p0 = scmp.lt.s32.totalorder %s1257_s25, %s945_s30 }
  0x20   : > { %408 = vmatprep.subr.bf16.mxu0 %v885_v10  ;;  %789 = vmatprep.subr.bf16.mxu1 %v922_v45 }
  0x23   : > { %409 = vmatpush1.bf16.msra.mxu0 %v887_v11  ;;  %790 = vmatpush3.bf16.msra.mxu1 %v923_v46 }
  0x24   : > { %410 = vmatprep.subr.bf16.mxu0 %v888_v12  ;;  %791 = vmatprep.subr.bf16.mxu1 %v924_v49 }
  0x27   : > { %411 = vmatpush1.bf16.msra.mxu0 %v890_v13  ;;  %792 = vmatpush3.bf16.msra.mxu1 %v925_v50 }
  0x28   : > { %412 = vmatprep.subr.bf16.mxu0 %v891_v15  ;;  %793 = vmatprep.subr.bf16.mxu1 %v926_v52 }
  0x2b   : > { %413 = vmatpush1.bf16.msra.mxu0 %v893_v17  ;;  %794 = vmatpush3.bf16.msra.mxu1 %v927_v54 }
  0x2c   : > { %414 = vmatprep.subr.bf16.mxu0 %v894_v18  ;;  %795 = vmatprep.subr.bf16.mxu1 %v928_v57 }
  0x2f   : > { %415 = vmatpush1.bf16.msra.mxu0 %v896_v19  ;;  %796 = vmatpush3.bf16.msra.mxu1 %v929_v58 }
  0x30   : > { %416 = vmatprep.subr.bf16.mxu0 %v897_v20  ;;  %797 = vmatprep.subr.bf16.mxu1 %v930_v59 }
  0x33   : > { %417 = vmatpush1.bf16.msra.mxu0 %v899_v21  ;;  %798 = vmatpush3.bf16.msra.mxu1 %v931_v61 }
  0x34   : > { %418 = vmatprep.subr.bf16.mxu0 %v900_v22  ;;  %799 = vmatprep.subr.bf16.mxu1 %v932_v62 }
  0x37   : > { %419 = vmatpush1.bf16.msra.mxu0 %v902_v23  ;;  %800 = vmatpush3.bf16.msra.mxu1 %v933_v63 }
  0x38   : > { %420 = vmatprep.subr.bf16.mxu0 %v903_v24  ;;  %807 = vmatprep.subr.bf16.mxu1 %v918_v36 }
  0x3b   : > { %421 = vmatpush1.bf16.msra.mxu0 %v905_v25 }
  0x3c   : > { %422 = vmatprep.subr.bf16.mxu0 %v906_v26 }
  0x3f   : > { %423 = vmatpush1.bf16.msra.mxu0 %v908_v27 }
  0x40   : > { %424 = vmatprep.subr.bf16.mxu0 %v909_v28 }
  0x43   : > { %425 = vmatpush1.bf16.msra.mxu0 %v911_v29 }
  0x44   : > { %426 = vmatprep.subr.bf16.mxu0 %v912_v30 }
  0x47   : > { %427 = vmatpush1.bf16.msra.mxu0 %v914_v31 }
  0x48   : > { %428 = vmatprep.subr.bf16.mxu0 %v915_v32 }
  0x4b   : > { %429 = vmatpush1.bf16.msra.mxu0 %v917_v33 }
  0x4e   : > { %431 = vmatmul.mubr.bf16.vlgmr.msra.gmra.mrb[0].mxu0 %v172_v35 }
 0x121   : > { %v432_v39 = vpop.f32.mrb[0].mxu0 }
 0x122   : > { %439 = vrot.lane.b32.xlu0 %v432_v39, %s1004_s5  ;;  %v434_v40 = vpop.f32.mrb[1].mxu0 }
 0x123   : > { %v436_v41 = vpop.f32.mrb[2].mxu0 }
 0x124   : > { %v437_v43 = vpop.f32.mrb[3].mxu0 }
 0x126   : > { %441 = vrot.lane.b32.xlu0 %v434_v40, %s1004_s5  ;;  %s940_s5 = scalar_lea.vmem %s1257_s25, 128 }
 0x127   : > { %p941_p11 = scmp.ne.s32.totalorder %s1257_s25, %s940_s5  ;;  %p948_p1 = scmp.lt.s32.totalorder %s946_s4, %s940_s5 }
 0x129   : > { %p942_p12 = pnand %p941_p11, %p1065_p5  ;;  %p949_p2 = por %p948_p1, %p947_p0 }
 0x12b   : > { %p943_p13 = pneg %p942_p12 }
 0x12d   : > { %p950_p3 = pnand %p949_p2, %p943_p13 }
 0x194   : > { %v440_v48 = vpop.permute.xlu0 %439 }
 0x198   : > { %v442_v51 = vpop.permute.xlu0 %441 }
 0x199   : > { %v447_v53 = vsel %vm445_vm0, %v442_v51, %v440_v48  ;;  %v446_v56 = vsel %vm445_vm0, %v440_v48, %v442_v51 }
 0x19a   : > { %v448_v55 = vmax.f32 %v432_v39, %v447_v53  ;;  %v449_v60 = vmax.f32 %v434_v40, %v446_v56 }
 0x19c   : > { %450 = vrot.lane.b32.xlu1 %v448_v55, %s1005_s26 }
 0x1a0   : > { %452 = vrot.lane.b32.xlu1 %v449_v60, %s1005_s26 }
 0x20e   : > { %v451_v0 = vpop.permute.xlu1 %450 }
 0x212   : > { %v453_v1 = vpop.permute.xlu1 %452 }
 0x213   : > { %v455_v2 = vsel %vm454_vm1, %v451_v0, %v453_v1  ;;  %v456_v3 = vsel %vm454_vm1, %v453_v1, %v451_v0 }
 0x214   : > { %v457_v4 = vmax.f32 %v448_v55, %v456_v3  ;;  %v458_v5 = vmax.f32 %v449_v60, %v455_v2 }
 0x216   : > { %v459_v6 = vmax.f32 %v457_v4, %v458_v5 }
 0x218   : > { %v460_v7 = vsub.f32 %v432_v39, %v459_v6  ;;  %v461_v8 = vsub.f32 %v434_v40, %v459_v6 }
 0x21a   : > { %v462_v9 = vmul.f32 1.442695, %v460_v7  ;;  %v464_v10 = vmul.f32 1.442695, %v461_v8 }
 0x21c   : > { %934 = vpow2.f32 %v462_v9 }
 0x21d   : > { %936 = vpow2.f32 %v464_v10 }
 0x226   : > { %v935_v11 = vpop.eup %934 }
 0x227   : > { %v937_v12 = vpop.eup %936  ;;  %v466_v13 = vpack.c.bf16 %v935_v11, %v935_v11 }
 0x228   : > { %v467_v15 = vpack.c.bf16 %v937_v12, %v937_v12  ;;  %v605_v16 = vmul.f32 %v937_v12, %v1125_v14  ;;  %v604_v14 = vmul.f32 %v935_v11, %v1184_v34 }
 0x22a   : > { %596 = vmatprep.mubr.bf16.mxu1 %v467_v15  ;;  %v607_v17 = vpack.c.bf16 %v605_v16, %v605_v16  ;;  %v606_v18 = vpack.c.bf16 %v604_v14, %v604_v14 }
 0x22b   : > { %597 = vmatmul.mubr.bf16.vlgmr.msra.gmra.mrb[0].mxu1 %v466_v13 }
 0x22c   : > { %808 = vmatpush3.bf16.msra.mxu1 %v1194_v37  ;;  %640 = vmatprep.mubr.bf16.mxu1 %v607_v17 }
 0x22d   : > { %809 = vmatprep.subr.bf16.mxu1 %v1199_v38 }
 0x230   : > { %810 = vmatpush3.bf16.msra.mxu1 %v1205_v42 }
 0x231   : > { %811 = vmatprep.subr.bf16.mxu1 %v922_v45 }
 0x234   : > { %812 = vmatpush3.bf16.msra.mxu1 %v923_v46 }
 0x235   : > { %813 = vmatprep.subr.bf16.mxu1 %v924_v49 }
 0x238   : > { %814 = vmatpush3.bf16.msra.mxu1 %v925_v50 }
 0x239   : > { %815 = vmatprep.subr.bf16.mxu1 %v926_v52 }
 0x23c   : > { %816 = vmatpush3.bf16.msra.mxu1 %v927_v54 }
 0x23d   : > { %817 = vmatprep.subr.bf16.mxu1 %v928_v57 }
 0x240   : > { %818 = vmatpush3.bf16.msra.mxu1 %v929_v58 }
 0x241   : > { %819 = vmatprep.subr.bf16.mxu1 %v930_v59 }
 0x244   : > { %820 = vmatpush3.bf16.msra.mxu1 %v931_v61 }
 0x245   : > { %821 = vmatprep.subr.bf16.mxu1 %v932_v62 }
 0x248   : > { %822 = vmatpush3.bf16.msra.mxu1 %v933_v63 }
 0x24b   : > { %641 = vmatmul.mubr.bf16.vlgmr.msra.gmra.mrb[4].mxu1 %v606_v18 }
 0x2fe   : > { %v801_v19 = vpop.f32.mrb[0].mxu1 }
 0x2ff   : > { %v802_v20 = vpop.f32.mrb[1].mxu1 }
 0x300   : > { %v803_v21 = vadd.f32 %v802_v20, %v801_v19  ;;  %v804_v22 = vpop.f32.mrb[2].mxu1 }
 0x301   : > { %v805_v23 = vpop.f32.mrb[3].mxu1 }
 0x302   : > { %938 = vrcp.f32 %v803_v21 }
 0x30c   : > { %v939_v28 = vpop.eup %938 }
 0x31e   : > { %v823_v24 = vpop.f32.mrb[4].mxu1 }
 0x31f   : > { %v824_v25 = vpop.f32.mrb[5].mxu1 }
 0x320   : > { %v825_v26 = vadd.f32 %v824_v25, %v823_v24  ;;  %v826_v27 = vpop.f32.mrb[6].mxu1 }
 0x321   : > { %v827_v29 = vpop.f32.mrb[7].mxu1 }
 0x322   : > { %v649_v30 = vmul.f32 %v939_v28, %v825_v26 }
 0x324   : > { %651 = vst.msk [vmem:[%s163_s24] sm:$0xff] %vm650_vm2, %v649_v30 }
 0x325   : > { %953 = shalt.err (!%p950_p3)
}
 0x326   : > { %s954_s6 = scalar_lea.hbm %s1255_s28, 128  ;;  %s958_s9 = scalar_lea.hbm %s1300_s3, 256 }
 0x327   : > { %p955_p4 = scmp.ne.s32.totalorder %s1255_s28, %s954_s6  ;;  %p959_p9 = scmp.lt.u32.totalorder %s1255_s28, %s1300_s3 }
 0x328   : > { %p960_p10 = scmp.lt.u32.totalorder %s958_s9, %s954_s6  ;;  %p962_p12 = scmp.lt.u32.totalorder %s954_s6, %s1255_s28 }
 0x329   : > { %p956_p7 = pnand %p955_p4, %p1065_p5 }
 0x32a   : > { %p961_p11 = por %p960_p10, %p959_p9 }
 0x32b   : > { %p957_p8 = pneg %p956_p7 }
 0x32c   : > { %p963_p13 = por %p962_p12, %p961_p11 }
 0x32e   : > { %p964_p0 = pnand %p963_p13, %p957_p8 }
 0x330   : > { %967 = shalt.err (!%p964_p0)
}
 0x331   : > { %829 = dma.vmem_to_hbm [thread:$0]  (%p1065_p5), %s1257_s25, 128, %s1255_s28, %s653_s16  }
 0x332 PF: > { %p835_p1 = scmp.ge.s32.totalorder %s1002_s15, 2  ;;  %s678_s17 = sand.u32 1, %s990_s12  }
 0x333   : > { %s679_s19 = scalar_lea.sflag [#allocation3], %s678_s17 }
 0x334   : > { %p832_p2 = pnand %p835_p1, %p1069_p6 }
 0x336   : > { %985 = dma.done.wait (!%p832_p2), %s679_s19, 128  }
 0x337   : > { %987 = vsyncadd (!%p832_p2), %s679_s19, 4294967168  ;;  %p13_p3 = scmp.ge.s32.totalorder %s1052_s18, 4   ;;  %s1303_s12 = smov %s994_s13 }
 0x338   : > { %s1304_s13 = smov %s998_s14  ;;  %s1305_s14 = smov %s1063_s21 }
 0x339   : > { %s1306_s15 = smov %s1052_s18  ;;  %15 = sbr.rel (!%p13_p3) target bundleno = 3 (0x3), region = 67 }
 0x340   :  { %684 = vsyncpa [#allocation3], 1 }
 0x341   :  { %686 = vsyncpa [#allocation3 + $0x1], 1 }

</bundles_post_ra>
